<compile_context>
chip_gen: v7x
topology: tpu7x:2x2x1
jax: 0.10.0
libtpu: 0.0.40
codegen_flags: <defaults>
</compile_context>

<pallas_src>
import jax
import jax.numpy as jnp
from jax.experimental import pallas as pl
from jax.experimental.pallas import tpu as pltpu


def _round_up(x, m):
    return (x + m - 1) // m * m


def _kernel_single_k(x_lhs_ref, w_ref, b_ref, x_res_ref, o_ref):
    """Whole K in one shot (no reduction loop).

    x_lhs_ref : (TM, Hp) f32  - full-K row tile of x (cast to bf16 for the MXU)
    w_ref     : (Hp, TN) bf16/f32
    b_ref     : (1,  TN) f32
    x_res_ref : (TM, TN) f32  - residual tile (same HBM array as x_lhs)
    o_ref     : (TM, TN) f32
    """
    acc = jnp.dot(
        x_lhs_ref[...].astype(jnp.bfloat16),
        w_ref[...].astype(jnp.bfloat16),
        preferred_element_type=jnp.float32,
    )
    o_ref[...] = (acc + b_ref[...] + x_res_ref[...]).astype(o_ref.dtype)


def _kernel_k_tiled(x_lhs_ref, w_ref, b_ref, x_res_ref, o_ref):
    """K-tiled variant: accumulate partial products directly into the f32
    output block (resident in VMEM across the k axis); bias + residual are
    folded in at k == 0, so no accumulator scratch and no acc->out copy."""
    k = pl.program_id(2)
    partial = jnp.dot(
        x_lhs_ref[...].astype(jnp.bfloat16),
        w_ref[...].astype(jnp.bfloat16),
        preferred_element_type=jnp.float32,
    )

    @pl.when(k == 0)
    def _():
        o_ref[...] = partial + b_ref[...] + x_res_ref[...]

    @pl.when(k > 0)
    def _():
        o_ref[...] += partial


def residual_linear(x, w, b):
    """Computes (x @ w + b) + x with a single fused Pallas kernel.

    x: (B, S, H) float32,  w: (H, H) float32,  b: (H,) float32.
    """
    B, S, H = x.shape
    M = B * S
    Hp = _round_up(H, 128)

    # ---- generation-aware VMEM budget (v7x-safe 64 MiB fallback) -----------
    try:
        vmem_cap = int(pltpu.get_tpu_info().vmem_capacity_bytes)
    except Exception:
        vmem_cap = 64 * 1024 * 1024
    if vmem_cap < 16 * 1024 * 1024:
        vmem_cap = 64 * 1024 * 1024
    vmem_budget = int(vmem_cap * 0.70)

    # ---- tile selection -----------------------------------------------------
    # TM: multiple of 16 (bf16 sublane packing), 128/512-aligned when M allows.
    if M >= 512:
        TM = 512
    elif M >= 128:
        TM = _round_up(M, 128)
    else:
        TM = _round_up(max(M, 1), 16)
    TN = 512 if Hp % 512 == 0 else (256 if Hp % 256 == 0 else 128)
    Mp = _round_up(M, TM)

    # v7x has 2 TensorCores: keep >= 2 tiles along some "parallel" axis if we can.
    if Mp // TM < 2 and Hp // TN < 2 and TN > 128:
        TN //= 2

    # ---- operands: avoid host-side copies unless padding / amortized cast ---
    if Hp != H:
        # We must copy to pad; fuse the bf16 cast into the same pass.
        w_in = jnp.pad(w, ((0, Hp - H), (0, Hp - H))).astype(jnp.bfloat16)
    elif (Mp // TM) >= 3:
        # One cast pass amortizes over many HBM re-reads of W.
        w_in = w.astype(jnp.bfloat16)
    else:
        w_in = w
    w_bytes = 2 if w_in.dtype == jnp.bfloat16 else 4

    x2d = x.reshape(M, H)
    if Mp != M or Hp != H:
        x_in = jnp.pad(x2d, ((0, Mp - M), (0, Hp - H)))
    else:
        x_in = x2d

    if Hp != H:
        b_in = jnp.pad(b, (0, Hp - H)).reshape(1, Hp)
    else:
        b_in = b.reshape(1, Hp)

    # ---- choose single-shot (no K loop) vs K-tiled ---------------------------
    def single_k_bytes(tm, tn):
        # double-buffered: x_lhs (tm,Hp) f32 + W (Hp,tn) + bias + x_res + out
        return 2 * (tm * Hp * 4 + Hp * tn * w_bytes + tn * 4
                    + tm * tn * 4 + tm * tn * 4)

    use_single_k = False
    for tn_try in (TN, 256, 128):
        if tn_try > TN or Hp % tn_try != 0:
            continue
        if single_k_bytes(TM, tn_try) <= vmem_budget:
            use_single_k = True
            TN = tn_try
            break

    if use_single_k:
        grid = (Mp // TM, Hp // TN)
        kernel = _kernel_single_k
        in_specs = [
            pl.BlockSpec((TM, Hp), lambda i, j: (i, 0)),   # x (full K) f32, MXU LHS
            pl.BlockSpec((Hp, TN), lambda i, j: (0, j)),   # W
            pl.BlockSpec((1, TN), lambda i, j: (0, j)),    # bias
            pl.BlockSpec((TM, TN), lambda i, j: (i, j)),   # x residual tile (same array)
        ]
        out_specs = pl.BlockSpec((TM, TN), lambda i, j: (i, j))
        dim_sem = ("parallel", "parallel")
        footprint = single_k_bytes(TM, TN)
    else:
        TK = 512 if Hp % 512 == 0 else (256 if Hp % 256 == 0 else 128)
        grid = (Mp // TM, Hp // TN, Hp // TK)
        kernel = _kernel_k_tiled
        in_specs = [
            pl.BlockSpec((TM, TK), lambda i, j, k: (i, k)),  # x f32 (MXU LHS)
            pl.BlockSpec((TK, TN), lambda i, j, k: (k, j)),  # W
            pl.BlockSpec((1, TN), lambda i, j, k: (0, j)),   # bias
            pl.BlockSpec((TM, TN), lambda i, j, k: (i, j)),  # x residual tile
        ]
        out_specs = pl.BlockSpec((TM, TN), lambda i, j, k: (i, j))
        dim_sem = ("parallel", "parallel", "arbitrary")
        footprint = 2 * (TM * TK * 4 + TK * TN * w_bytes + TN * 4
                         + TM * TN * 4 + TM * TN * 4)

    vmem_limit = int(min(max(2 * footprint, 32 * 1024 * 1024), vmem_cap * 0.8))

    out2d = pl.pallas_call(
        kernel,
        out_shape=jax.ShapeDtypeStruct((Mp, Hp), x.dtype),
        grid_spec=pltpu.PrefetchScalarGridSpec(
            num_scalar_prefetch=0,
            grid=grid,
            in_specs=in_specs,
            out_specs=out_specs,
        ),
        compiler_params=pltpu.CompilerParams(
            dimension_semantics=dim_sem,
            vmem_limit_bytes=vmem_limit,
        ),
    )(x_in, w_in, b_in, x_in)

    if Mp != M or Hp != H:
        out2d = out2d[:M, :H]
    return out2d.reshape(B, S, H)


if __name__ == "__main__":
    key = jax.random.PRNGKey(0)
    k_x, k_w, k_b = jax.random.split(key, 3)

    batch, seq, hidden = 2, 8, 32

    x = jax.random.normal(k_x, (batch, seq, hidden), dtype=jnp.float32)
    # xavier_normal_-style init for the Linear weight (fan_in = fan_out = hidden)
    std = (2.0 / (hidden + hidden)) ** 0.5
    w = jax.random.normal(k_w, (hidden, hidden), dtype=jnp.float32) * std
    b = jax.random.normal(k_b, (hidden,), dtype=jnp.float32) * 0.01

    out = residual_linear(x, w, b)
    out = jax.block_until_ready(out)

    # Reference in plain JAX (f32). Kernel feeds the MXU bf16 operands, so use a
    # tolerance appropriate for bf16 rounding.
    ref = (jnp.einsum("bsh,hk->bsk", x, w) + b) + x
    assert out.shape == (batch, seq, hidden)
    assert jnp.allclose(out, ref, atol=5e-2, rtol=5e-2), (
        float(jnp.max(jnp.abs(out - ref)))
    )

    print("KERNEL_OK")
</pallas_src>

<mosaic_0001>
module attributes {stable_mosaic.version = 11 : i64} {
  func.func @_kernel_single_k(%arg0: i32, %arg1: i32, %arg2: memref<16x128xf32, #tpu.memory_space<vmem>>, %arg3: memref<128x128xbf16, #tpu.memory_space<vmem>>, %arg4: memref<1x128xf32, #tpu.memory_space<vmem>>, %arg5: memref<16x128xf32, #tpu.memory_space<vmem>>, %arg6: memref<16x128xf32, #tpu.memory_space<vmem>>) attributes {dimension_semantics = [#tpu.dimension_semantics<parallel>, #tpu.dimension_semantics<parallel>], iteration_bounds = array<i64: 1, 1>, scalar_prefetch = 0 : i64, scratch_operands = 0 : i64, tpu.core_type = #tpu.core_type<tc>, window_params = [{transform_indices = @transform_0, window_bounds = array<i64: 16, 128>}, {transform_indices = @transform_1, window_bounds = array<i64: 128, 128>}, {transform_indices = @transform_2, window_bounds = array<i64: 1, 128>}, {transform_indices = @transform_3, window_bounds = array<i64: 16, 128>}, {transform_indices = @transform_4, window_bounds = array<i64: 16, 128>}]} {
    %c0 = arith.constant 0 : index
    %c0_0 = arith.constant 0 : index
    %0 = vector.load %arg2[%c0, %c0_0] : memref<16x128xf32, #tpu.memory_space<vmem>>, vector<16x128xf32>
    %1 = arith.truncf %0 : vector<16x128xf32> to vector<16x128xbf16>
    %c0_1 = arith.constant 0 : index
    %c0_2 = arith.constant 0 : index
    %2 = vector.load %arg3[%c0_1, %c0_2] : memref<128x128xbf16, #tpu.memory_space<vmem>>, vector<128x128xbf16>
    %cst = arith.constant dense<0.000000e+00> : vector<16x128xf32>
    %3 = tpu.matmul %1, %2, %cst {dimension_numbers = #tpu.dot_dimension_numbers<[1], [0], [0], [1], [0, 0, 1, 1], [], []>} : vector<16x128xbf16>, vector<128x128xbf16>, vector<16x128xf32> -> vector<16x128xf32>
    %c0_3 = arith.constant 0 : index
    %c0_4 = arith.constant 0 : index
    %4 = vector.load %arg4[%c0_3, %c0_4] : memref<1x128xf32, #tpu.memory_space<vmem>>, vector<1x128xf32>
    %5 = vector.broadcast %4 : vector<1x128xf32> to vector<16x128xf32>
    %6 = arith.addf %3, %5 : vector<16x128xf32>
    %c0_5 = arith.constant 0 : index
    %c0_6 = arith.constant 0 : index
    %7 = vector.load %arg5[%c0_5, %c0_6] : memref<16x128xf32, #tpu.memory_space<vmem>>, vector<16x128xf32>
    %8 = arith.addf %6, %7 : vector<16x128xf32>
    %c0_7 = arith.constant 0 : index
    %c0_8 = arith.constant 0 : index
    %9 = vector.load %arg6[%c0_7, %c0_8] : memref<16x128xf32, #tpu.memory_space<vmem>>, vector<16x128xf32>
    tpu.vector_store %arg6[%c0_7, %c0_8], %8 {strides = array<i32>} : memref<16x128xf32, #tpu.memory_space<vmem>>, vector<16x128xf32>,
    return
  }
  func.func @transform_0(%arg0: i32, %arg1: i32) -> (i32, i32) {
    %c0_i32 = arith.constant 0 : i32
    %c0_i32_0 = arith.constant 0 : i32
    return %arg0, %c0_i32 : i32, i32
  }
  func.func @transform_1(%arg0: i32, %arg1: i32) -> (i32, i32) {
    %c0_i32 = arith.constant 0 : i32
    %c0_i32_0 = arith.constant 0 : i32
    return %c0_i32, %arg1 : i32, i32
  }
  func.func @transform_2(%arg0: i32, %arg1: i32) -> (i32, i32) {
    %c0_i32 = arith.constant 0 : i32
    %c0_i32_0 = arith.constant 0 : i32
    return %c0_i32, %arg1 : i32, i32
  }
  func.func @transform_3(%arg0: i32, %arg1: i32) -> (i32, i32) {
    %c0_i32 = arith.constant 0 : i32
    return %arg0, %arg1 : i32, i32
  }
  func.func @transform_4(%arg0: i32, %arg1: i32) -> (i32, i32) {
    %c0_i32 = arith.constant 0 : i32
    return %arg0, %arg1 : i32, i32
  }
}

</mosaic_0001>

<bundles_post_ra>
// kernel: tpu_custom_call.1
= control target key start
LH: loop header
LB: loop body
LE: loop exit
PB: predicated region body
PF: predicated region fallthrough
CT: control target
= control target key end

     0   :  { %9 = vsyncpa [#allocation3], 0  ;;  %s444_s0 = inlined_call_operand.hbm [shape: f32[16,128], index: 0, kind: input, shape index: {}]   ;;  %s445_s1 = inlined_call_operand.hbm [shape: bf16[128,128], index: 1, kind: input, shape index: {}]   ;;  %s446_s2 = inlined_call_operand.vmem [shape: f32[1,128], index: 2, kind: input, shape index: {}]   ;;  %s447_s3 = inlined_call_operand.hbm [shape: f32[16,128], index: 3, kind: input, shape index: {}]   ;;  %s448_s4 = inlined_call_operand.hbm [shape: f32[16,128], index: 4, kind: output, shape index: {}]  }
   0x1   :  { %10 = vsyncpa [#allocation6], 0 }
   0x2   :  { %11 = vsyncpa [#allocation4], 0  ;;  %s349_s15 = smov [#allocation5]   ;;  %s255_s19 = scalar_lea.hbm %s445_s1, 1024 }
   0x3   :  { %s29_s16 = sshll.u32 %s349_s15, 4  ;;  %p256_p0 = scmp.ne.s32.totalorder %s445_s1, %s255_s19  ;;  %s30_s16 = int_to_ptr.vmem [resolvable:$true] %s29_s16 }
   0x4   :  { %p259_p1 = scmp.lt.u32.totalorder %s255_s19, %s445_s1 }
   0x6   :  { %p261_p2 = pnand %p259_p1, %p256_p0 }
   0x8   :  { %264 = shalt.err (!%p261_p2)
}
   0x9   :  { %s265_s24 = scalar_lea.vmem %s30_s16, 1024  ;;  %p270_p4 = scmp.lt.s32.totalorder %s30_s16, %s30_s16 }
   0xa   :  { %p266_p3 = scmp.ne.s32.totalorder %s30_s16, %s265_s24  ;;  %p271_p5 = scmp.lt.s32.totalorder %s265_s24, %s265_s24 }
   0xc   :  { %p272_p6 = por %p271_p5, %p270_p4 }
   0xe   :  { %p273_p7 = pnand %p272_p6, %p266_p3 }
  0x10   :  { %276 = shalt.err (!%p273_p7)
}
  0x11   :  { %s350_s25 = smov 64   ;;  %s351_s26 = smov 4  }
  0x12   :  { %35 = dma.hbm_to_vmem [thread:$0]  %s445_s1, 1024, %s30_s16, [#allocation6], %s350_s25, %s350_s25, %s351_s26  }
  0x13   :  { %s352_s29 = smov [#allocation2]   ;;  %s277_s7 = scalar_lea.hbm %s444_s0, 256 }
  0x14   :  { %s17_s30 = sshll.u32 %s352_s29, 4  ;;  %p278_p8 = scmp.ne.s32.totalorder %s444_s0, %s277_s7  ;;  %s18_s30 = int_to_ptr.vmem [resolvable:$true] %s17_s30 }
  0x15   :  { %p281_p9 = scmp.lt.u32.totalorder %s277_s7, %s444_s0 }
  0x17   :  { %p283_p10 = pnand %p281_p9, %p278_p8 }
  0x19   :  { %286 = shalt.err (!%p283_p10)
}
  0x1a   :  { %s287_s12 = scalar_lea.vmem %s18_s30, 256  ;;  %p292_p12 = scmp.lt.s32.totalorder %s18_s30, %s18_s30 }
  0x1b   :  { %p288_p11 = scmp.ne.s32.totalorder %s18_s30, %s287_s12  ;;  %p293_p13 = scmp.lt.s32.totalorder %s287_s12, %s287_s12 }
  0x1d   :  { %p294_p0 = por %p293_p13, %p292_p12 }
  0x1f   :  { %p295_p1 = pnand %p294_p0, %p288_p11 }
  0x21   :  { %298 = shalt.err (!%p295_p1)
}
  0x22   :  { %s353_s1 = smov 128   ;;  %s354_s13 = smov 8  }
  0x23   :  { %23 = dma.hbm_to_vmem [thread:$0]  %s444_s0, 256, %s18_s30, [#allocation3], %s353_s1, %s353_s1, %s354_s13  }
  0x24   :  { %s355_s16 = smov [#allocation7]   ;;  %s299_s20 = scalar_lea.hbm %s447_s3, 256 }
  0x25   :  { %s43_s17 = sshll.u32 %s355_s16, 4  ;;  %p300_p2 = scmp.ne.s32.totalorder %s447_s3, %s299_s20  ;;  %s44_s17 = int_to_ptr.vmem [resolvable:$true] %s43_s17 }
  0x26   :  { %p303_p3 = scmp.lt.u32.totalorder %s299_s20, %s447_s3 }
  0x28   :  { %p305_p4 = pnand %p303_p3, %p300_p2 }
  0x2a   :  { %308 = shalt.err (!%p305_p4)
}
  0x2b   :  { %s309_s25 = scalar_lea.vmem %s44_s17, 256  ;;  %p314_p6 = scmp.lt.s32.totalorder %s44_s17, %s44_s17 }
  0x2c   :  { %p310_p5 = scmp.ne.s32.totalorder %s44_s17, %s309_s25  ;;  %p315_p7 = scmp.lt.s32.totalorder %s309_s25, %s309_s25 }
  0x2e   :  { %p316_p8 = por %p315_p7, %p314_p6 }
  0x30   :  { %p317_p9 = pnand %p316_p8, %p310_p5 }
  0x32   :  { %320 = shalt.err (!%p317_p9)
}
  0x33   :  { %49 = dma.hbm_to_vmem [thread:$0]  %s447_s3, 256, %s44_s17, [#allocation6], %s353_s1, %s353_s1, %s354_s13  }
  0x34   :  { %343 = dma.done.wait [#allocation3], 256  }
  0x35   :  { %344 = vsyncadd [#allocation3], 4294967040 }
  0x36   :  { %345 = dma.done.wait [#allocation6], 1280  }
  0x37   :  { %346 = vsyncadd [#allocation6], 4294966016  ;;  %v356_v0 = vmov 0.0   ;;  %vm357_vm0 = vmmov 0   ;;  %v247_v1 = vld [vmem:[#allocation5] sm:$0xff]   ;;  %v248_v2 = vld [vmem:[#allocation5 + $0x8] sm:$0xff]  }
  0x38   :  { %217 = vmatprep.subr.bf16.mxu0 %v356_v0  ;;  %233 = vmatprep.mubr.msk.bf16.mxu0 %vm357_vm0, %v356_v0  ;;  %v249_v3 = vld [vmem:[#allocation5 + $0x10] sm:$0xff]   ;;  %v250_v4 = vld [vmem:[#allocation5 + $0x18] sm:$0xff]   ;;  %v251_v5 = vld [vmem:[#allocation5 + $0x20] sm:$0xff]   ;;  %s358_s28 = smov [#allocation8]  }
  0x39   :  { %218 = vmatpush3.bf16.msra.mxu0 %v247_v1  ;;  %v252_v6 = vld [vmem:[#allocation5 + $0x28] sm:$0xff]   ;;  %v253_v7 = vld [vmem:[#allocation5 + $0x30] sm:$0xff]   ;;  %v254_v8 = vld [vmem:[#allocation5 + $0x38] sm:$0xff]   ;;  %s186_s29 = sshll.u32 %s358_s28, 4  ;;  %s187_s29 = int_to_ptr.vmem [resolvable:$true] %s186_s29 }
  0x3a   :  { %219 = vmatprep.subr.bf16.mxu0 %v356_v0  ;;  %v60_v9 = vld [vmem:[#allocation2] sm:$0xff]  ;;  %v61_v10 = vld [vmem:[#allocation2 + $0x8] sm:$0xff]  ;;  %v175_v14 = vld [vmem:[#allocation7] sm:$0xff]  ;;  %s321_s30 = scalar_lea.vmem %s187_s29, 256  ;;  %p326_p11 = scmp.lt.s32.totalorder %s187_s29, %s187_s29 }
  0x3b   :  { %v62_v11 = vpack.c.bf16 %v61_v10, %v60_v9  ;;  %v199_v12 = vld [vmem:[%s446_s2] ss:$0 sm:$0xff]  ;;  %v176_v18 = vld [vmem:[#allocation7 + $0x8] sm:$0xff]  ;;  %p322_p10 = scmp.ne.s32.totalorder %s187_s29, %s321_s30  ;;  %p327_p12 = scmp.lt.s32.totalorder %s321_s30, %s321_s30 }
  0x3d   :  { %220 = vmatpush3.bf16.msra.mxu0 %v248_v2  ;;  %p328_p13 = por %p327_p12, %p326_p11 }
  0x3e   :  { %221 = vmatprep.subr.bf16.mxu0 %v356_v0 }
  0x3f   :  { %p329_p0 = pnand %p328_p13, %p322_p10 }
  0x41   :  { %222 = vmatpush3.bf16.msra.mxu0 %v249_v3 }
  0x42   :  { %223 = vmatprep.subr.bf16.mxu0 %v356_v0 }
  0x45   :  { %224 = vmatpush3.bf16.msra.mxu0 %v250_v4 }
  0x46   :  { %225 = vmatprep.subr.bf16.mxu0 %v356_v0 }
  0x49   :  { %226 = vmatpush3.bf16.msra.mxu0 %v251_v5 }
  0x4a   :  { %227 = vmatprep.subr.bf16.mxu0 %v356_v0 }
  0x4d   :  { %228 = vmatpush3.bf16.msra.mxu0 %v252_v6 }
  0x4e   :  { %229 = vmatprep.subr.bf16.mxu0 %v356_v0 }
  0x51   :  { %230 = vmatpush3.bf16.msra.mxu0 %v253_v7 }
  0x52   :  { %231 = vmatprep.subr.bf16.mxu0 %v356_v0 }
  0x55   :  { %232 = vmatpush3.bf16.msra.mxu0 %v254_v8 }
  0x58   :  { %234 = vmatmul.mubr.bf16.vlgmr.msra.gmra.mrb[0].mxu0 %v62_v11 }
 0x12b   :  { %v168_v13 = vpop.f32.mrb[0].mxu0 }
 0x12c   :  { %v169_v15 = vadd.f32 %v199_v12, %v168_v13  ;;  %v235_v16 = vpop.f32.mrb[1].mxu0 }
 0x12d   :  { %v171_v17 = vpop.f32.mrb[2].mxu0 }
 0x12e   :  { %v177_v19 = vadd.f32 %v175_v14, %v169_v15  ;;  %v172_v20 = vadd.f32 %v199_v12, %v171_v17  ;;  %v236_v21 = vpop.f32.mrb[3].mxu0 }
 0x130   :  { %179 = vst [vmem:[#allocation8] sm:$0xff] %v177_v19  ;;  %v178_v22 = vadd.f32 %v176_v18, %v172_v20 }
 0x132   :  { %180 = vst [vmem:[#allocation8 + $0x8] sm:$0xff] %v178_v22 }
 0x133   :  { %332 = shalt.err (!%p329_p0)
}
 0x134   :  { %s333_s6 = scalar_lea.hbm %s448_s4, 256 }
 0x135   :  { %p334_p1 = scmp.ne.s32.totalorder %s448_s4, %s333_s6  ;;  %p337_p2 = scmp.lt.u32.totalorder %s333_s6, %s448_s4 }
 0x137   :  { %p339_p3 = pnand %p337_p2, %p334_p1 }
 0x139   :  { %342 = shalt.err (!%p339_p3)
}
 0x13a   :  { %192 = dma.vmem_to_hbm [thread:$0]  %s187_s29, 256, %s448_s4, [#allocation4], %s353_s1, %s353_s1, %s354_s13  }
 0x13b   :  { %347 = dma.done.wait [#allocation4], 256  }
 0x13c   :  { %348 = vsyncadd [#allocation4], 4294967040 }
 0x13d   :  { %196 = vsyncpa [#allocation3], 1 }
 0x13e   :  { %197 = vsyncpa [#allocation6], 1 }
 0x13f   :  { %198 = vsyncpa [#allocation4], 1 }

</bundles_post_ra>
